<compile_context>
chip_gen: v7x
topology: tpu7x:2x2x1
jax: 0.10.0
libtpu: 0.0.40
codegen_flags: <defaults>
</compile_context>

<pallas_src>
import jax
import jax.numpy as jnp
from jax.experimental import pallas as pl
from jax.experimental.pallas import tpu as pltpu

_LANES = 128        # vreg lane width: pad feature dims to this for unmasked stores
_SUBLANES_BF16 = 16 # bf16 sublane packing: keep batch-tile a multiple of this


def _round_up(n: int, m: int) -> int:
    return ((n + m - 1) // m) * m


def _net_kernel(x_ref, w1_ref, b1_ref, w2_ref, b2_ref, o_ref):
    # One batch tile per grid step; weights/biases are VMEM-resident (constant
    # index_map), only the x tile and out tile stream HBM<->VMEM.
    x = x_ref[...]                                                    # [TB, I]  bf16
    h = jnp.dot(x, w1_ref[...], preferred_element_type=jnp.float32)   # MXU, f32 acc
    h = jax.nn.sigmoid(h + b1_ref[...])                               # f32 VPU/EUP
    h = h.astype(jnp.bfloat16)                                        # bf16 MXU operand
    y = jnp.dot(h, w2_ref[...], preferred_element_type=jnp.float32)   # MXU, f32 acc
    y = jax.nn.sigmoid(y + b2_ref[...])                               # f32
    o_ref[...] = y.astype(o_ref.dtype)                                # lane-dense store


def net_forward(x, w1, b1, w2, b2, *, batch_tile: int = 512):
    """Forward for Net.

    x : [B, I] float
    w1: [H, I], b1: [H]   (torch nn.Linear layout: [out_features, in_features])
    w2: [O, H], b2: [O]
    returns [B, O] float32
    """
    B, I = x.shape
    H = w1.shape[0]
    O = w2.shape[0]

    # ---- one-time glue (outside the hot loop) ------------------------------
    Hp = _round_up(H, _LANES)
    Op = _round_up(O, _LANES)

    # Transpose to [in, out] and zero-pad to lane width. Padded hidden units
    # come out of the first sigmoid as 0.5, but their rows in w2 are zero, so
    # they contribute nothing; padded output columns are sliced off below.
    w1_t = jnp.zeros((I, Hp), jnp.bfloat16).at[:, :H].set(w1.T.astype(jnp.bfloat16))
    w2_t = jnp.zeros((Hp, Op), jnp.bfloat16).at[:H, :O].set(w2.T.astype(jnp.bfloat16))
    b1_row = jnp.zeros((1, Hp), jnp.float32).at[0, :H].set(b1.astype(jnp.float32))
    b2_row = jnp.zeros((1, Op), jnp.float32).at[0, :O].set(b2.astype(jnp.float32))

    # Batch tile: amortizes the ~0.35 us per-step overhead while staying tiny
    # relative to v7x's 32 MiB scoped VMEM (512x128 f32 out tile ~256 KB).
    TB = min(batch_tile, _round_up(B, _SUBLANES_BF16))
    TB = _round_up(TB, _SUBLANES_BF16)
    Bp = _round_up(B, TB)                       # pad batch -> full blocks only
    x_p = jnp.zeros((Bp, I), jnp.bfloat16).at[:B, :].set(x.astype(jnp.bfloat16))

    grid = (Bp // TB,)

    out_padded = pl.pallas_call(
        _net_kernel,
        out_shape=jax.ShapeDtypeStruct((Bp, Op), jnp.float32),
        grid=grid,
        in_specs=[
            pl.BlockSpec((TB, I), lambda i: (i, 0)),     # x: streamed per tile
            pl.BlockSpec((I, Hp), lambda i: (0, 0)),     # W1: resident
            pl.BlockSpec((1, Hp), lambda i: (0, 0)),     # b1: resident
            pl.BlockSpec((Hp, Op), lambda i: (0, 0)),    # W2: resident
            pl.BlockSpec((1, Op), lambda i: (0, 0)),     # b2: resident
        ],
        out_specs=pl.BlockSpec((TB, Op), lambda i: (i, 0)),
        compiler_params=pltpu.CompilerParams(
            dimension_semantics=("parallel",),           # v7x: batch across 2 TCs
            vmem_limit_bytes=32 * 1024 * 1024,
        ),
    )(x_p, w1_t, b1_row, w2_t, b2_row)

    return out_padded[:B, :O]


def reference_forward(x, w1, b1, w2, b2):
    h = jax.nn.sigmoid(x @ w1.T + b1)
    return jax.nn.sigmoid(h @ w2.T + b2)


if __name__ == "__main__":
    # Shapes implied by Net(inputSize, hiddenSize, outputSize); small demo.
    B, inputSize, hiddenSize, outputSize = 32, 32, 32, 8

    key = jax.random.PRNGKey(0)
    kx, k1, kb1, k2, kb2 = jax.random.split(key, 5)

    x = jax.random.normal(kx, (B, inputSize), dtype=jnp.float32)

    bound1 = 1.0 / jnp.sqrt(inputSize)
    w1 = jax.random.uniform(k1, (hiddenSize, inputSize), jnp.float32, -bound1, bound1)
    b1 = jax.random.uniform(kb1, (hiddenSize,), jnp.float32, -bound1, bound1)

    bound2 = 1.0 / jnp.sqrt(hiddenSize)
    w2 = jax.random.uniform(k2, (outputSize, hiddenSize), jnp.float32, -bound2, bound2)
    b2 = jax.random.uniform(kb2, (outputSize,), jnp.float32, -bound2, bound2)

    # batch_tile=16 to exercise the batch grid (2 steps) at demo size; the
    # default (512) is what a real deployment batch would use.
    out = net_forward(x, w1, b1, w2, b2, batch_tile=16)
    out = jax.block_until_ready(out)

    ref = reference_forward(x, w1, b1, w2, b2)
    assert out.shape == (B, outputSize)
    # bf16 MXU operands + f32 accumulation vs fp32 reference: bf16-level tolerance.
    assert jnp.allclose(out, ref, atol=2e-2, rtol=2e-2), "mismatch vs reference"

    print("KERNEL_OK")
</pallas_src>

<mosaic_0001>
module attributes {stable_mosaic.version = 11 : i64} {
  func.func @_net_kernel(%arg0: i32, %arg1: memref<16x32xbf16, #tpu.memory_space<vmem>>, %arg2: memref<32x128xbf16, #tpu.memory_space<vmem>>, %arg3: memref<1x128xf32, #tpu.memory_space<vmem>>, %arg4: memref<128x128xbf16, #tpu.memory_space<vmem>>, %arg5: memref<1x128xf32, #tpu.memory_space<vmem>>, %arg6: memref<16x128xf32, #tpu.memory_space<vmem>>) attributes {dimension_semantics = [#tpu.dimension_semantics<parallel>], iteration_bounds = array<i64: 2>, scalar_prefetch = 0 : i64, scratch_operands = 0 : i64, tpu.core_type = #tpu.core_type<tc>, window_params = [{transform_indices = @transform_0, window_bounds = array<i64: 16, 32>}, {pipeline_mode = #tpu.pipeline_mode<synchronous>, transform_indices = @transform_1, window_bounds = array<i64: 32, 128>}, {pipeline_mode = #tpu.pipeline_mode<synchronous>, transform_indices = @transform_2, window_bounds = array<i64: 1, 128>}, {pipeline_mode = #tpu.pipeline_mode<synchronous>, transform_indices = @transform_3, window_bounds = array<i64: 128, 128>}, {pipeline_mode = #tpu.pipeline_mode<synchronous>, transform_indices = @transform_4, window_bounds = array<i64: 1, 128>}, {transform_indices = @transform_5, window_bounds = array<i64: 16, 128>}]} {
    %c0 = arith.constant 0 : index
    %c0_0 = arith.constant 0 : index
    %0 = vector.load %arg1[%c0, %c0_0] : memref<16x32xbf16, #tpu.memory_space<vmem>>, vector<16x32xbf16>
    %c0_1 = arith.constant 0 : index
    %c0_2 = arith.constant 0 : index
    %1 = vector.load %arg2[%c0_1, %c0_2] : memref<32x128xbf16, #tpu.memory_space<vmem>>, vector<32x128xbf16>
    %cst = arith.constant dense<0.000000e+00> : vector<16x128xf32>
    %2 = tpu.matmul %0, %1, %cst {dimension_numbers = #tpu.dot_dimension_numbers<[1], [0], [0], [1], [0, 0, 1, 1], [], []>} : vector<16x32xbf16>, vector<32x128xbf16>, vector<16x128xf32> -> vector<16x128xf32>
    %c0_3 = arith.constant 0 : index
    %c0_4 = arith.constant 0 : index
    %3 = vector.load %arg3[%c0_3, %c0_4] : memref<1x128xf32, #tpu.memory_space<vmem>>, vector<1x128xf32>
    %4 = vector.broadcast %3 : vector<1x128xf32> to vector<16x128xf32>
    %5 = arith.addf %2, %4 : vector<16x128xf32>
    %6 = arith.negf %5 : vector<16x128xf32>
    %7 = math.exp %6 : vector<16x128xf32>
    %cst_5 = arith.constant 1.000000e+00 : f32
    %8 = vector.broadcast %cst_5 : f32 to vector<16x128xf32>
    %9 = arith.addf %8, %7 : vector<16x128xf32>
    %10 = arith.divf %8, %9 : vector<16x128xf32>
    %11 = arith.truncf %10 : vector<16x128xf32> to vector<16x128xbf16>
    %c0_6 = arith.constant 0 : index
    %c0_7 = arith.constant 0 : index
    %12 = vector.load %arg4[%c0_6, %c0_7] : memref<128x128xbf16, #tpu.memory_space<vmem>>, vector<128x128xbf16>
    %cst_8 = arith.constant dense<0.000000e+00> : vector<16x128xf32>
    %13 = tpu.matmul %11, %12, %cst_8 {dimension_numbers = #tpu.dot_dimension_numbers<[1], [0], [0], [1], [0, 0, 1, 1], [], []>} : vector<16x128xbf16>, vector<128x128xbf16>, vector<16x128xf32> -> vector<16x128xf32>
    %c0_9 = arith.constant 0 : index
    %c0_10 = arith.constant 0 : index
    %14 = vector.load %arg5[%c0_9, %c0_10] : memref<1x128xf32, #tpu.memory_space<vmem>>, vector<1x128xf32>
    %15 = vector.broadcast %14 : vector<1x128xf32> to vector<16x128xf32>
    %16 = arith.addf %13, %15 : vector<16x128xf32>
    %17 = arith.negf %16 : vector<16x128xf32>
    %18 = math.exp %17 : vector<16x128xf32>
    %cst_11 = arith.constant 1.000000e+00 : f32
    %19 = vector.broadcast %cst_11 : f32 to vector<16x128xf32>
    %20 = arith.addf %19, %18 : vector<16x128xf32>
    %21 = arith.divf %19, %20 : vector<16x128xf32>
    %c0_12 = arith.constant 0 : index
    %c0_13 = arith.constant 0 : index
    %22 = vector.load %arg6[%c0_12, %c0_13] : memref<16x128xf32, #tpu.memory_space<vmem>>, vector<16x128xf32>
    tpu.vector_store %arg6[%c0_12, %c0_13], %21 {strides = array<i32>} : memref<16x128xf32, #tpu.memory_space<vmem>>, vector<16x128xf32>,
    return
  }
  func.func @transform_0(%arg0: i32) -> (i32, i32) {
    %c0_i32 = arith.constant 0 : i32
    %c0_i32_0 = arith.constant 0 : i32
    return %arg0, %c0_i32 : i32, i32
  }
  func.func @transform_1(%arg0: i32) -> (i32, i32) {
    %c0_i32 = arith.constant 0 : i32
    %c0_i32_0 = arith.constant 0 : i32
    %c0_i32_1 = arith.constant 0 : i32
    return %c0_i32, %c0_i32_0 : i32, i32
  }
  func.func @transform_2(%arg0: i32) -> (i32, i32) {
    %c0_i32 = arith.constant 0 : i32
    %c0_i32_0 = arith.constant 0 : i32
    %c0_i32_1 = arith.constant 0 : i32
    return %c0_i32, %c0_i32_0 : i32, i32
  }
  func.func @transform_3(%arg0: i32) -> (i32, i32) {
    %c0_i32 = arith.constant 0 : i32
    %c0_i32_0 = arith.constant 0 : i32
    %c0_i32_1 = arith.constant 0 : i32
    return %c0_i32, %c0_i32_0 : i32, i32
  }
  func.func @transform_4(%arg0: i32) -> (i32, i32) {
    %c0_i32 = arith.constant 0 : i32
    %c0_i32_0 = arith.constant 0 : i32
    %c0_i32_1 = arith.constant 0 : i32
    return %c0_i32, %c0_i32_0 : i32, i32
  }
  func.func @transform_5(%arg0: i32) -> (i32, i32) {
    %c0_i32 = arith.constant 0 : i32
    %c0_i32_0 = arith.constant 0 : i32
    return %arg0, %c0_i32 : i32, i32
  }
}

</mosaic_0001>

<bundles_post_ra>
// kernel: tpu_custom_call.1
= control target key start
LH: loop header
LB: loop body
LE: loop exit
PB: predicated region body
PF: predicated region fallthrough
CT: control target
= control target key end

     0   :  { %10 = vsyncpa [#allocation3], 0  ;;  %s1221_s0 = inlined_call_operand.hbm [shape: bf16[32,32], index: 0, kind: input, shape index: {}]   ;;  %s1222_s1 = inlined_call_operand.hbm [shape: bf16[32,128], index: 1, kind: input, shape index: {}]   ;;  %s1223_s2 = inlined_call_operand.vmem [shape: f32[1,128], index: 2, kind: input, shape index: {}]   ;;  %s1224_s3 = inlined_call_operand.hbm [shape: bf16[128,128], index: 3, kind: input, shape index: {}]   ;;  %s1225_s4 = inlined_call_operand.vmem [shape: f32[1,128], index: 4, kind: input, shape index: {}]   ;;  %s1226_s5 = inlined_call_operand.hbm [shape: f32[32,128], index: 5, kind: output, shape index: {}]  }
   0x1   :  { %12 = vsyncpa [#allocation3 + $0x1], 0 }
   0x2   :  { %13 = vsyncpa [#allocation6], 0 }
   0x3   :  { %14 = vsyncpa [#allocation4], 0 }
   0x4   :  { %16 = vsyncpa [#allocation4 + $0x1], 0  ;;  %s971_s18 = smov 0   ;;  %s973_s19 = smov 0  }
   0x5   :  { %s975_s20 = smov 0   ;;  %s977_s21 = smov 0  }
   0x6 LB: > { %s992_s22 = sadd.s32 4294967295, %s929_s21   ;;  %s595_s23 = sadd.s32 4294967294, %s929_s21   ;;  %s929_s21 = sphi %s977_s21, %s1246_s21   ;;  %s925_s20 = sphi %s975_s20, %s1245_s20   ;;  %s921_s19 = sphi %s973_s19, %s1244_s19   ;;  %s917_s18 = sphi %s971_s18, %s1243_s18  }
   0x7   : > { %p42_p0 = scmp.ne.s32.totalorder %s921_s19, %s917_s18  ;;  %p1227_p1 = scmp.eq.s32.totalorder %s992_s22, 0 }
   0x8   : > { %p156_p3 = scmp.eq.s32.totalorder %s595_s23, 1  ;;  %p596_p5 = scmp.ge.s32.totalorder %s929_s21, 1 }
   0x9   : > { %p1001_p4 = por %p1227_p1, %p42_p0  ;;  %p163_p7 = scmp.lt.s32.totalorder %s929_s21, 3 }
   0xa   : > { %p1006_p6 = por %p156_p3, %p42_p0  ;;  %s931_s27 = smov [#allocation5]  }
   0xb   : > { %s1230_s24 = scalar_select %p1001_p4, 1, 0 }
   0xc   : > { %s1231_s25 = scalar_select %p1006_p6, 1, 0 }
   0xd   : > { %p1011_p8 = pnand %p596_p5, %p163_p7  ;;  %s175_s28 = sshll.u32 %s931_s27, 4  ;;  %s1015_s28 = int_to_ptr.vmem [resolvable:$true] %s175_s28 }
   0xe   : > { %s932_s30 = smov [#allocation7]   ;;  %s773_s9 = scalar_lea.hbm %s1222_s1, 256 }
   0xf   : > { %p685_p9 = pneg %p1011_p8  ;;  %s191_s6 = sshll.u32 %s932_s30, 4  ;;  %s1026_s6 = int_to_ptr.vmem [resolvable:$true] %s191_s6 }
  0x10   : > { %p774_p12 = scmp.ne.s32.totalorder %s1222_s1, %s773_s9  ;;  %p780_p5 = scmp.lt.u32.totalorder %s773_s9, %s1222_s1 }
  0x11   : > { %p1022_p11 = pnand %p685_p9, %p1227_p1 }
  0x13   : > { %p775_p13 = pneg %p1022_p11 }
  0x15   : > { %p776_p0 = pnand %p775_p13, %p774_p12 }
  0x17   : > { %p777_p3 = pneg %p776_p0 }
  0x19   : > { %p782_p7 = pnand %p780_p5, %p777_p3 }
  0x1b   : > { %785 = shalt.err (!%p782_p7)
}
  0x1c   : > { %s786_s14 = scalar_lea.vmem %s1015_s28, 256  ;;  %p794_p2 = scmp.lt.s32.totalorder %s1015_s28, %s1015_s28 }
  0x1d   : > { %p787_p9 = scmp.ne.s32.totalorder %s1015_s28, %s786_s14  ;;  %p795_p12 = scmp.lt.s32.totalorder %s786_s14, %s786_s14 }
  0x1f   : > { %p789_p10 = pnand %p787_p9, %p775_p13  ;;  %p796_p0 = por %p795_p12, %p794_p2 }
  0x21   : > { %p790_p1 = pneg %p789_p10 }
  0x23   : > { %p797_p6 = pnand %p796_p0, %p790_p1 }
  0x25   : > { %800 = shalt.err (!%p797_p6)
}
  0x26   : > { %s933_s15 = smov 64   ;;  %s934_s16 = smov 4  }
  0x27   : > { %688 = dma.hbm_to_vmem [thread:$0]  (!%p1022_p11), %s1222_s1, 256, %s1015_s28, [#allocation6], %s933_s15, %s933_s15, %s934_s16  }
  0x28   : > { %s801_s7 = scalar_lea.hbm %s1224_s3, 1024 }
  0x29   : > { %p802_p1 = scmp.ne.s32.totalorder %s1224_s3, %s801_s7  ;;  %p808_p10 = scmp.lt.u32.totalorder %s801_s7, %s1224_s3 }
  0x2b   : > { %p804_p2 = pnand %p802_p1, %p775_p13 }
  0x2d   : > { %p805_p6 = pneg %p804_p2 }
  0x2f   : > { %p810_p3 = pnand %p808_p10, %p805_p6 }
  0x31   : > { %813 = shalt.err (!%p810_p3)
}
  0x32   : > { %s814_s28 = scalar_lea.vmem %s1026_s6, 1024  ;;  %p822_p12 = scmp.lt.s32.totalorder %s1026_s6, %s1026_s6 }
  0x33   : > { %p815_p5 = scmp.ne.s32.totalorder %s1026_s6, %s814_s28  ;;  %p823_p0 = scmp.lt.s32.totalorder %s814_s28, %s814_s28 }
  0x35   : > { %p817_p7 = pnand %p815_p5, %p775_p13  ;;  %p824_p1 = por %p823_p0, %p822_p12 }
  0x37   : > { %p818_p9 = pneg %p817_p7 }
  0x39   : > { %p825_p2 = pnand %p824_p1, %p818_p9 }
  0x3b   : > { %828 = shalt.err (!%p825_p2)
}
  0x3c   : > { %691 = dma.hbm_to_vmem [thread:$0]  (!%p1022_p11), %s1224_s3, 1024, %s1026_s6, [#allocation6], %s933_s15, %s933_s15, %s934_s16  }
  0x3d   : > { %s1087_s29 = sadd.s32 1, %s929_s21   ;;  %s29_s14 = sadd.s32 1, %s925_s20 }
  0x3e   : > { %s26_s17 = ssub.s32 %s929_s21, %s1087_s29  ;;  %p36_p13 = scmp.ne.s32.totalorder %s925_s20, %s921_s19 }
  0x3f   : > { %p27_p6 = scmp.eq.s32.totalorder %s26_s17, 0  ;;  %p37_p10 = scmp.eq.s32.totalorder %s929_s21, 0 }
  0x40   : > { %p1234_p3 = scmp.eq.s32.totalorder %s992_s22, 1  ;;  %p702_p7 = scmp.lt.s32.totalorder %s929_s21, 2 }
  0x41   : > { %s1103_s27 = scalar_select %p27_p6, %s925_s20, %s29_s14  }
  0x42   : > { %p1097_p5 = por %p1234_p3, %p36_p13  ;;  %p38_p9 = por %p37_p10, %p36_p13 }
  0x43   : > { %s208_s30 = sand.u32 1, %s925_s20   ;;  %s631_s6 = sshll.u32 %s929_s21, 7 }
  0x44   : > { %s1235_s23 = scalar_select %p1097_p5, 1, 0 }
  0x45   : > { %s600_s7 = sshll.u32 %s208_s30, 3  ;;  %s1110_s10 = scalar_lea.hbm %s1221_s0, %s631_s6 }
  0x46   : > { %s212_s11 = scalar_lea.vmem [#allocation2], %s600_s7  ;;  %p1114_p11 = pnand %p702_p7, %p38_p9 }
  0x47   : > { %s219_s28 = sshll.u32 %s212_s11, 4  ;;  %s1118_s13 = scalar_lea.sflag [#allocation3], %s208_s30  ;;  %s1112_s28 = int_to_ptr.vmem [resolvable:$true] %s219_s28 }
  0x48   : > { %s829_s14 = scalar_lea.hbm %s1110_s10, 128  ;;  %p831_p0 = pneg %p1114_p11 }
  0x49   : > { %p830_p12 = scmp.ne.s32.totalorder %s1110_s10, %s829_s14  ;;  %s834_s6 = scalar_lea.hbm %s1221_s0, 256 }
  0x4a   : > { %p835_p13 = scmp.lt.u32.totalorder %s1110_s10, %s1221_s0  ;;  %p836_p6 = scmp.lt.u32.totalorder %s834_s6, %s829_s14 }
  0x4b   : > { %p832_p1 = pnand %p831_p0, %p830_p12  ;;  %p838_p3 = scmp.lt.u32.totalorder %s829_s14, %s1110_s10 }
  0x4c   : > { %p837_p10 = por %p836_p6, %p835_p13 }
  0x4d   : > { %p833_p2 = pneg %p832_p1 }
  0x4e   : > { %p839_p7 = por %p838_p3, %p837_p10 }
  0x50   : > { %p840_p9 = pnand %p839_p7, %p833_p2 }
  0x52   : > { %843 = shalt.err (!%p840_p9)
}
  0x53   : > { %s844_s30 = scalar_lea.vmem %s1112_s28, 128  ;;  %s935_s11 = smov [#allocation2]  }
  0x54   : > { %p845_p12 = scmp.ne.s32.totalorder %s1112_s28, %s844_s30  ;;  %s849_s17 = sshll.u32 %s935_s11, 4  ;;  %s850_s17 = int_to_ptr.vmem [resolvable:$false] %s849_s17 }
  0x55   : > { %s851_s7 = scalar_lea.vmem %s850_s17, 256  ;;  %p852_p4 = scmp.lt.s32.totalorder %s1112_s28, %s850_s17 }
  0x56   : > { %p847_p1 = pnand %p845_p12, %p831_p0  ;;  %p853_p13 = scmp.lt.s32.totalorder %s851_s7, %s844_s30 }
  0x58   : > { %p848_p5 = pneg %p847_p1  ;;  %p854_p6 = por %p853_p13, %p852_p4 }
  0x5a   : > { %p855_p10 = pnand %p854_p6, %p848_p5 }
  0x5c   : > { %858 = shalt.err (!%p855_p10)
}
  0x5d   : > { %695 = dma.hbm_to_vmem [thread:$0]  (!%p1114_p11), %s1110_s10, 128, %s1112_s28, %s1118_s13, %s933_s15, %s933_s15, %s934_s16  }
  0x5e   : > { %231 = sbr.rel (%p1011_p8) target bundleno = 616 (0x268), region = 40  ;;  %s1152_s14 = sand.u32 (!%p1011_p8), 1, %s921_s19  }
  0x5f   : > { %s604_s6 = sshll.u32 (!%p1011_p8), %s1152_s14, 3  ;;  %s234_s8 = scalar_lea.sflag (!%p1011_p8), [#allocation3], %s1152_s14 }
  0x60   : > { %s237_s9 = scalar_lea.vmem (!%p1011_p8), [#allocation2], %s604_s6  ;;  %p1237_p4 = scmp.ne.s32.totalorder (!%p1011_p8), %s1230_s24, 0 }
  0x65   : > { %904 = dma.done.wait (%p1237_p4), %s234_s8, 128  }
  0x66   : > { %906 = vsyncadd (%p1237_p4), %s234_s8, 4294967168  ;;  %p1238_p5 = scmp.eq.s32.totalorder %s992_s22, 0 }
  0x68   : > { %908 = dma.done.wait (%p1238_p5), [#allocation6], 1280   ;;  %p1239_p11 = pmov %p1238_p5 }
  0x69   : > { %v936_v0 = vmov 0.0   ;;  %vm937_vm0 = vmmov 0   ;;  %v746_v1 = vld [vmem:[#allocation5] sm:$0xff]   ;;  %v747_v2 = vld [vmem:[#allocation5 + $0x8] sm:$0xff]   ;;  %v748_v3 = vld [vmem:[%s237_s9] sm:$0xff]   ;;  %vm305_vm1 = vcmask 261120  }
  0x6a   : > { %910 = vsyncadd (%p1239_p11), [#allocation6], 4294966016  ;;  %645 = vmatprep.subr.bf16.mxu0 %v936_v0  ;;  %649 = vmatprep.mubr.msk.bf16.mxu0 %vm937_vm0, %v936_v0  ;;  %v749_v4 = vld [vmem:[#allocation7] sm:$0xff]   ;;  %v750_v5 = vld [vmem:[#allocation7 + $0x8] sm:$0xff]   ;;  %s607_s10 = sshll.u32 %s1152_s14, 4  ;;  %s632_s28 = sshll.u32 %s992_s22, 8 }
  0x6b   : > { %653 = vmatprep.subr.bf16.mxu1 %v936_v0  ;;  %669 = vmatprep.mubr.msk.bf16.mxu1 %vm937_vm0, %v936_v0  ;;  %v751_v6 = vld [vmem:[#allocation7 + $0x10] sm:$0xff]   ;;  %v752_v7 = vld [vmem:[#allocation7 + $0x18] sm:$0xff]   ;;  %v753_v8 = vld [vmem:[#allocation7 + $0x20] sm:$0xff]   ;;  %s271_s12 = scalar_lea.vmem [#allocation8], %s607_s10  ;;  %s1175_s17 = scalar_lea.hbm %s1226_s5, %s632_s28 }
  0x6c   : > { %646 = vmatpush3.bf16.msra.mxu0 %v746_v1  ;;  %654 = vmatpush3.bf16.msra.mxu1 %v749_v4  ;;  %v754_v9 = vld [vmem:[#allocation7 + $0x28] sm:$0xff]   ;;  %v755_v10 = vld [vmem:[#allocation7 + $0x30] sm:$0xff]   ;;  %v756_v11 = vld [vmem:[#allocation7 + $0x38] sm:$0xff]   ;;  %s503_s13 = sshll.u32 %s271_s12, 4  ;;  %s490_s7 = scalar_lea.sflag [#allocation4], %s1152_s14  ;;  %s1177_s13 = int_to_ptr.vmem [resolvable:$true] %s503_s13 }
  0x6d   : > { %647 = vmatprep.subr.bf16.mxu0 %v936_v0  ;;  %655 = vmatprep.subr.bf16.mxu1 %v936_v0  ;;  %v608_v12 = vld [vmem:[%s1223_s2] ss:$0 sm:$0xff]  ;;  %s859_s6 = scalar_lea.vmem %s1177_s13, 256  ;;  %p1240_p0 = scmp.ne.s32.totalorder %s1235_s23, 0 }
  0x6e   : > { %v615_v28 = vld [vmem:[%s1225_s4] ss:$0 sm:$0xff]  ;;  %p860_p8 = scmp.ne.s32.totalorder %s1177_s13, %s859_s6  ;;  %s938_s22 = smov [#allocation8]  }
  0x6f   : > { %s863_s8 = sshll.u32 %s938_s22, 4  ;;  %s864_s8 = int_to_ptr.vmem [resolvable:$false] %s863_s8 }
  0x70   : > { %648 = vmatpush3.bf16.msra.mxu0 %v747_v2  ;;  %656 = vmatpush3.bf16.msra.mxu1 %v750_v5  ;;  %p861_p2 = pnand %p860_p8, %p1240_p0  ;;  %s865_s9 = scalar_lea.vmem %s864_s8, 512 }
  0x71   : > { %657 = vmatprep.subr.bf16.mxu1 %v936_v0  ;;  %p866_p7 = scmp.lt.s32.totalorder %s1177_s13, %s864_s8  ;;  %p867_p9 = scmp.lt.s32.totalorder %s865_s9, %s859_s6 }
  0x72   : > { %p862_p3 = pneg %p861_p2 }
  0x73   : > { %650 = vmatmul.mubr.msk.bf16.vlgmr.msra.gmra.mrb[0].mxu0 %vm305_vm1, %v748_v3  ;;  %p868_p12 = por %p867_p9, %p866_p7 }
  0x74   : > { %658 = vmatpush3.bf16.msra.mxu1 %v751_v6 }
  0x75   : > { %659 = vmatprep.subr.bf16.mxu1 %v936_v0  ;;  %p869_p1 = pnand %p868_p12, %p862_p3 }
  0x78   : > { %660 = vmatpush3.bf16.msra.mxu1 %v752_v7 }
  0x79   : > { %661 = vmatprep.subr.bf16.mxu1 %v936_v0 }
  0x7c   : > { %662 = vmatpush3.bf16.msra.mxu1 %v753_v8 }
  0x7d   : > { %663 = vmatprep.subr.bf16.mxu1 %v936_v0 }
  0x80   : > { %664 = vmatpush3.bf16.msra.mxu1 %v754_v9 }
  0x81   : > { %665 = vmatprep.subr.bf16.mxu1 %v936_v0 }
  0x84   : > { %666 = vmatpush3.bf16.msra.mxu1 %v755_v10 }
  0x85   : > { %667 = vmatprep.subr.bf16.mxu1 %v936_v0 }
  0x88   : > { %668 = vmatpush3.bf16.msra.mxu1 %v756_v11 }
 0x146   : > { %v343_v13 = vpop.f32.mrb[0].mxu0 }
 0x147   : > { %v344_v14 = vadd.f32 %v608_v12, %v343_v13  ;;  %v651_v15 = vpop.f32.mrb[1].mxu0 }
 0x148   : > { %v346_v16 = vpop.f32.mrb[2].mxu0 }
 0x149   : > { %v613_v17 = vmul.f32 -1.442695, %v344_v14  ;;  %v347_v18 = vadd.f32 %v608_v12, %v346_v16  ;;  %v652_v19 = vpop.f32.mrb[3].mxu0 }
 0x14b   : > { %757 = vpow2.f32 %v613_v17  ;;  %v614_v20 = vmul.f32 -1.442695, %v347_v18 }
 0x14d   : > { %759 = vpow2.f32 %v614_v20 }
 0x155   : > { %v758_v21 = vpop.eup %757 }
 0x156   : > { %v356_v22 = vadd.f32 1.0, %v758_v21 }
 0x157   : > { %v760_v23 = vpop.eup %759 }
 0x158   : > { %v357_v24 = vadd.f32 1.0, %v760_v23  ;;  %761 = vrcp.f32 %v356_v22 }
 0x15a   : > { %763 = vrcp.f32 %v357_v24 }
 0x162   : > { %v762_v25 = vpop.eup %761 }
 0x164   : > { %v764_v26 = vpop.eup %763 }
 0x165   : > { %v362_v27 = vpack.c.bf16 %v764_v26, %v762_v25 }
 0x167   : > { %670 = vmatmul.mubr.bf16.vlgmr.msra.gmra.mrb[0].mxu1 %v362_v27 }
 0x23a   : > { %v468_v29 = vpop.f32.mrb[0].mxu1 }
 0x23b   : > { %v469_v30 = vadd.f32 %v615_v28, %v468_v29  ;;  %v671_v31 = vpop.f32.mrb[1].mxu1 }
 0x23c   : > { %v471_v32 = vpop.f32.mrb[2].mxu1 }
 0x23d   : > { %v624_v33 = vmul.f32 -1.442695, %v469_v30  ;;  %v472_v34 = vadd.f32 %v615_v28, %v471_v32  ;;  %v672_v35 = vpop.f32.mrb[3].mxu1 }
 0x23f   : > { %765 = vpow2.f32 %v624_v33  ;;  %v625_v36 = vmul.f32 -1.442695, %v472_v34 }
 0x241   : > { %767 = vpow2.f32 %v625_v36 }
 0x249   : > { %v766_v37 = vpop.eup %765 }
 0x24a   : > { %v481_v38 = vadd.f32 1.0, %v766_v37 }
 0x24b   : > { %v768_v39 = vpop.eup %767 }
 0x24c   : > { %769 = vrcp.f32 %v481_v38  ;;  %v482_v40 = vadd.f32 1.0, %v768_v39 }
 0x24e   : > { %771 = vrcp.f32 %v482_v40 }
 0x256   : > { %v770_v41 = vpop.eup %769 }
 0x257   : > { %487 = vst [vmem:[%s271_s12] sm:$0xff] %v770_v41 }
 0x258   : > { %v772_v42 = vpop.eup %771 }
 0x259   : > { %488 = vst [vmem:[%s271_s12 + $0x8] sm:$0xff] %v772_v42 }
 0x25a   : > { %872 = shalt.err (!%p869_p1)
}
 0x25b   : > { %s873_s24 = scalar_lea.hbm %s1175_s17, 256  ;;  %s877_s16 = scalar_lea.hbm %s1226_s5, 512 }
 0x25c   : > { %p874_p13 = scmp.ne.s32.totalorder %s1175_s17, %s873_s24  ;;  %p878_p4 = scmp.lt.u32.totalorder %s1175_s17, %s1226_s5 }
 0x25d   : > { %p879_p5 = scmp.lt.u32.totalorder %s877_s16, %s873_s24  ;;  %p881_p8 = scmp.lt.u32.totalorder %s873_s24, %s1175_s17 }
 0x25e   : > { %p875_p6 = pnand %p874_p13, %p1240_p0 }
 0x25f   : > { %p880_p11 = por %p879_p5, %p878_p4 }
 0x260   : > { %p876_p10 = pneg %p875_p6 }
 0x261   : > { %p882_p2 = por %p881_p8, %p880_p11 }
 0x263   : > { %p883_p3 = pnand %p882_p2, %p876_p10 }
 0x265   : > { %886 = shalt.err (!%p883_p3)
}
 0x266   : > { %s939_s12 = smov 128   ;;  %s940_s30 = smov 8  }
 0x267   : > { %683 = dma.vmem_to_hbm [thread:$0]  (%p1240_p0), %s1177_s13, 256, %s1175_s17, %s490_s7, %s939_s12, %s939_s12, %s940_s30  }
 0x268 PF: > { %s518_s11 = sand.u32 1, %s917_s18   ;;  %p1241_p7 = scmp.ne.s32.totalorder %s1231_s25, 0 }
 0x269   : > { %p1242_p9 = scmp.ge.s32.totalorder %s929_s21, 2  ;;  %s519_s6 = scalar_lea.sflag [#allocation4], %s518_s11 }
 0x26b   : > { %p697_p12 = pnand %p1242_p9, %p1241_p7 }
 0x26d   : > { %912 = dma.done.wait (!%p697_p12), %s519_s6, 256  }
 0x26e   : > { %914 = vsyncadd (!%p697_p12), %s519_s6, 4294967040  ;;  %p19_p1 = scmp.ge.s32.totalorder %s1087_s29, 4   ;;  %s1243_s18 = smov %s921_s19 }
 0x26f   : > { %s1244_s19 = smov %s925_s20  ;;  %s1245_s20 = smov %s1103_s27 }
 0x270   : > { %s1246_s21 = smov %s1087_s29  ;;  %21 = sbr.rel (!%p19_p1) target bundleno = 6 (0x6), region = 93 }
 0x277   :  { %524 = vsyncpa [#allocation3], 1 }
 0x278   :  { %526 = vsyncpa [#allocation3 + $0x1], 1 }
 0x279   :  { %527 = vsyncpa [#allocation6], 1 }
 0x27a   :  { %528 = vsyncpa [#allocation4], 1 }
 0x27b   :  { %530 = vsyncpa [#allocation4 + $0x1], 1 }

</bundles_post_ra>
